<compile_context>
chip_gen: v6e
topology: v6e:2x2x1
jax: 0.10.0
libtpu: 0.0.40
codegen_flags: <defaults>
</compile_context>

<pallas_src>
import numpy as np
import jax
import jax.numpy as jnp
from jax.experimental import pallas as pl
from jax.experimental.pallas import tpu as pltpu

_VMEM_LIMIT_BYTES = 32 * 1024 * 1024     # safe on every generation (<= v7x 64 MiB physical)
_TARGET_BLOCK_BYTES = 2 * 1024 * 1024    # ~2 MiB f32 per block -> near HBM roofline


# ---------------------------------------------------------------------------
# Kernels
# ---------------------------------------------------------------------------
def _softmax_last_kernel(x_ref, o_ref):
    # block: (rows_tile, K); softmax along the last (lane) dim.
    x = x_ref[...].astype(jnp.float32)
    m = jnp.max(x, axis=-1, keepdims=True)
    e = jnp.exp(x - m)
    s = jnp.sum(e, axis=-1, keepdims=True)
    # One reciprocal per row + broadcast multiply instead of a per-element divide.
    # approx=False keeps full f32 accuracy (the kernel is HBM-bound anyway).
    o_ref[...] = (e * pl.reciprocal(s, approx=False)).astype(o_ref.dtype)


def _softmax_mid_kernel(x_ref, o_ref):
    # block: (1, K, lane_tile); softmax along the middle axis, lanes stay dense.
    # For small K (e.g. channels=4) this is a short unrolled VPU reduction.
    x = x_ref[...].astype(jnp.float32)
    m = jnp.max(x, axis=1, keepdims=True)
    e = jnp.exp(x - m)
    s = jnp.sum(e, axis=1, keepdims=True)
    o_ref[...] = (e * pl.reciprocal(s, approx=False)).astype(o_ref.dtype)


# ---------------------------------------------------------------------------
# pallas_call wrappers
# ---------------------------------------------------------------------------
def _softmax_last_pallas(x2):
    """Softmax over the last dim of a 2-D (rows, K) view."""
    rows, K = x2.shape

    # Adaptive row tile: ~2 MiB f32 block, multiple of 8 (or the full extent),
    # and at least 2 grid blocks when possible (v7x dual TensorCores).
    rows_tile = max(1, _TARGET_BLOCK_BYTES // (K * 4))
    if rows_tile < rows:
        rows_tile = max(8, (rows_tile // 8) * 8)
    rows_tile = min(rows_tile, rows)
    if rows >= 16 and rows_tile >= rows:
        rows_tile = max(8, ((rows // 2) // 8) * 8)
    # TODO(synk): add a K-tiled online-softmax variant for K so large that even
    # an 8-row block exceeds the VMEM budget (running max/sum accumulators,
    # "arbitrary" K grid axis, finalize with pl.when on the last K step).

    grid = (pl.cdiv(rows, rows_tile),)
    return pl.pallas_call(
        _softmax_last_kernel,
        out_shape=jax.ShapeDtypeStruct((rows, K), x2.dtype),
        grid_spec=pltpu.PrefetchScalarGridSpec(
            num_scalar_prefetch=0,
            grid=grid,
            in_specs=[pl.BlockSpec((rows_tile, K), lambda i: (i, 0))],
            out_specs=pl.BlockSpec((rows_tile, K), lambda i: (i, 0)),
        ),
        compiler_params=pltpu.CompilerParams(
            dimension_semantics=("parallel",),
            vmem_limit_bytes=_VMEM_LIMIT_BYTES,
        ),
    )(x2)


def _softmax_mid_pallas(x3):
    """Softmax over the middle dim of a 3-D (outer, K, inner) view (lane-dense)."""
    outer, K, inner = x3.shape

    # Adaptive lane tile: ~2 MiB f32 block (1, K, lane_tile); lane_tile is a
    # multiple of 128, or the full `inner` extent.
    lane_tile = max(128, (_TARGET_BLOCK_BYTES // (K * 4) // 128) * 128)
    if lane_tile >= inner:
        lane_tile = inner
        if outer == 1 and inner >= 256:
            # keep >= 2 lane blocks so v7x's two TensorCores both get work
            lane_tile = max(128, ((inner // 2) // 128) * 128)

    grid = (outer, pl.cdiv(inner, lane_tile))
    return pl.pallas_call(
        _softmax_mid_kernel,
        out_shape=jax.ShapeDtypeStruct((outer, K, inner), x3.dtype),
        grid_spec=pltpu.PrefetchScalarGridSpec(
            num_scalar_prefetch=0,
            grid=grid,
            in_specs=[pl.BlockSpec((1, K, lane_tile), lambda n, s: (n, 0, s))],
            out_specs=pl.BlockSpec((1, K, lane_tile), lambda n, s: (n, 0, s)),
        ),
        compiler_params=pltpu.CompilerParams(
            dimension_semantics=("parallel", "parallel"),
            vmem_limit_bytes=_VMEM_LIMIT_BYTES,
        ),
    )(x3)


# ---------------------------------------------------------------------------
# Dispatch / glue
# ---------------------------------------------------------------------------
def _normalize_axes(axis, ndim):
    if isinstance(axis, (int, np.integer)):
        axis = (int(axis),)
    axes = tuple(int(a) % ndim for a in axis)
    if len(set(axes)) != len(axes):
        raise ValueError("repeated axis")
    return axes


def dpipe_softmax(x, axis):
    """JAX/Pallas equivalent of dpipe's multidimensional softmax."""
    axes = _normalize_axes(axis, x.ndim)
    shape = x.shape
    K = int(np.prod([shape[a] for a in axes]))

    srt = tuple(sorted(axes))
    contiguous = srt == tuple(range(srt[0], srt[-1] + 1))

    if contiguous:
        # Pure reshape (no HBM transpose): view as (outer, K, inner).
        a0, a1 = srt[0], srt[-1]
        outer = int(np.prod(shape[:a0])) if a0 > 0 else 1
        inner = int(np.prod(shape[a1 + 1:])) if a1 + 1 < x.ndim else 1
        if inner == 1:
            y = _softmax_last_pallas(x.reshape(outer, K))
        else:
            y = _softmax_mid_pallas(x.reshape(outer, K, inner))
        return y.reshape(shape)

    # Non-contiguous softmax axes: fall back to moveaxis-to-end (one transpose)
    # + lane-reduction kernel, then undo.
    dim = len(axes)
    dest = tuple(range(-dim, 0))
    xm = jnp.moveaxis(x, axes, dest)
    moved_shape = xm.shape
    rows = int(np.prod(moved_shape[:-dim])) if x.ndim > dim else 1
    y2 = _softmax_last_pallas(xm.reshape(rows, K))
    return jnp.moveaxis(y2.reshape(moved_shape), dest, axes)


class SoftmaxPallas:
    """Pallas counterpart of dpipe.layers.shape.Softmax."""

    def __init__(self, axis):
        self.axis = axis

    def __call__(self, x):
        return dpipe_softmax(x, self.axis)


if __name__ == "__main__":
    key = jax.random.PRNGKey(0)

    # NCHW input, softmax over the channel axis (axis=1): exercises the
    # transpose-free lane-dense "mid" path (outer=N, K=C, inner=H*W).
    x = jax.random.normal(key, (2, 4, 16, 16), dtype=jnp.float32)
    module = SoftmaxPallas(axis=1)
    y = jax.block_until_ready(module(x))
    ref = jax.nn.softmax(x, axis=1)
    assert y.shape == x.shape and y.dtype == x.dtype
    np.testing.assert_allclose(np.asarray(y), np.asarray(ref), rtol=1e-5, atol=1e-5)

    # Trailing-axis softmax: exercises the (rows, K) lane-reduction path.
    x2 = jax.random.normal(jax.random.PRNGKey(1), (8, 32, 256), dtype=jnp.float32)
    y2 = jax.block_until_ready(SoftmaxPallas(axis=-1)(x2))
    np.testing.assert_allclose(np.asarray(y2), np.asarray(jax.nn.softmax(x2, axis=-1)),
                               rtol=1e-5, atol=1e-5)

    # Non-contiguous multi-axis softmax: exercises the moveaxis fallback.
    y3 = jax.block_until_ready(SoftmaxPallas(axis=(1, 3))(x))
    np.testing.assert_allclose(np.asarray(y3), np.asarray(jax.nn.softmax(x, axis=(1, 3))),
                               rtol=1e-5, atol=1e-5)

    print("KERNEL_OK")
</pallas_src>

<mosaic_0001>
module attributes {stable_mosaic.version = 11 : i64} {
  func.func @_softmax_mid_kernel(%arg0: i32, %arg1: i32, %arg2: memref<1x4x256xf32, #tpu.memory_space<vmem>>, %arg3: memref<1x4x256xf32, #tpu.memory_space<vmem>>) attributes {dimension_semantics = [#tpu.dimension_semantics<parallel>, #tpu.dimension_semantics<parallel>], iteration_bounds = array<i64: 2, 1>, scalar_prefetch = 0 : i64, scratch_operands = 0 : i64, tpu.core_type = #tpu.core_type<tc>, window_params = [{transform_indices = @transform_0, window_bounds = array<i64: 1, 4, 256>}, {transform_indices = @transform_1, window_bounds = array<i64: 1, 4, 256>}]} {
    %c0 = arith.constant 0 : index
    %c0_0 = arith.constant 0 : index
    %c0_1 = arith.constant 0 : index
    %0 = vector.load %arg2[%c0, %c0_0, %c0_1] : memref<1x4x256xf32, #tpu.memory_space<vmem>>, vector<1x4x256xf32>
    %cst = arith.constant dense<0xFF800000> : vector<1x256xf32>
    %1 = vector.multi_reduction <maximumf>, %0, %cst [1] : vector<1x4x256xf32> to vector<1x256xf32>
    %2 = vector.shape_cast %1 : vector<1x256xf32> to vector<1x1x256xf32>
    %3 = vector.broadcast %2 : vector<1x1x256xf32> to vector<1x4x256xf32>
    %4 = arith.subf %0, %3 : vector<1x4x256xf32>
    %5 = math.exp %4 : vector<1x4x256xf32>
    %cst_2 = arith.constant dense<0.000000e+00> : vector<1x256xf32>
    %6 = vector.multi_reduction <add>, %5, %cst_2 [1] : vector<1x4x256xf32> to vector<1x256xf32>
    %7 = vector.shape_cast %6 : vector<1x256xf32> to vector<1x1x256xf32>
    %8 = tpu.reciprocal %7 : vector<1x1x256xf32> -> vector<1x1x256xf32>
    %9 = vector.broadcast %8 : vector<1x1x256xf32> to vector<1x4x256xf32>
    %10 = arith.mulf %5, %9 : vector<1x4x256xf32>
    %c0_3 = arith.constant 0 : index
    %c0_4 = arith.constant 0 : index
    %c0_5 = arith.constant 0 : index
    %11 = vector.load %arg3[%c0_3, %c0_4, %c0_5] : memref<1x4x256xf32, #tpu.memory_space<vmem>>, vector<1x4x256xf32>
    tpu.vector_store %arg3[%c0_3, %c0_4, %c0_5], %10 {strides = array<i32>} : memref<1x4x256xf32, #tpu.memory_space<vmem>>, vector<1x4x256xf32>,
    return
  }
  func.func @transform_0(%arg0: i32, %arg1: i32) -> (i32, i32, i32) {
    %c0_i32 = arith.constant 0 : i32
    %c0_i32_0 = arith.constant 0 : i32
    return %arg0, %c0_i32, %arg1 : i32, i32, i32
  }
  func.func @transform_1(%arg0: i32, %arg1: i32) -> (i32, i32, i32) {
    %c0_i32 = arith.constant 0 : i32
    %c0_i32_0 = arith.constant 0 : i32
    return %arg0, %c0_i32, %arg1 : i32, i32, i32
  }
}

</mosaic_0001>

<bundles_post_ra>
// kernel: tpu_custom_call.1
= control target key start
LH: loop header
LB: loop body
LE: loop exit
PB: predicated region body
PF: predicated region fallthrough
CT: control target
= control target key end

     0   :  { %6 = vsyncpa [#allocation3], 0  ;;  %s655_s0 = inlined_call_operand.hbm [shape: f32[2,4,256], index: 0, kind: input, shape index: {}]   ;;  %s656_s1 = inlined_call_operand.hbm [shape: f32[2,4,256], index: 1, kind: output, shape index: {}]  }
   0x1   :  { %8 = vsyncpa [#allocation3 + $0x1], 0 }
   0x2   :  { %9 = vsyncpa [#allocation4], 0 }
   0x3   :  { %11 = vsyncpa [#allocation4 + $0x1], 0  ;;  %s513_s6 = smov 0   ;;  %s515_s7 = smov 0  }
   0x4   :  { %s517_s8 = smov 0   ;;  %s519_s9 = smov 0  }
   0x5   :  { %s521_s10 = smov 0   ;;  %s523_s11 = smov 0  }
   0x6 LB: > { %s305_s12 = sadd.s32 4294967295, %s499_s11   ;;  %s306_s13 = sadd.s32 4294967294, %s499_s11   ;;  %s499_s11 = sphi %s523_s11, %s17_s11   ;;  %s495_s10 = sphi %s521_s10, %s668_s10   ;;  %s491_s9 = sphi %s519_s9, %s667_s9   ;;  %s487_s8 = sphi %s517_s8, %s666_s8   ;;  %s483_s7 = sphi %s515_s7, %s665_s7   ;;  %s479_s6 = sphi %s513_s6, %s664_s6  }
   0x7   : > { %s29_s14 = sadd.s32 1, %s495_s10  ;;  %s38_s15 = sadd.s32 1, %s487_s8 }
   0x8   : > { %p31_p0 = scmp.ge.s32.totalorder %s29_s14, 2  ;;  %p45_p1 = scmp.ne.s32.totalorder %s487_s8, %s483_s7 }
   0x9   : > { %p46_p2 = scmp.eq.s32.totalorder %s499_s11, 0  ;;  %p51_p3 = scmp.ne.s32.totalorder %s483_s7, %s479_s6 }
   0xa   : > { %s670_s14 = smov (%p31_p0, %s29_s14), 0  ;;  %p52_p5 = scmp.eq.s32.totalorder %s305_s12, 0 }
   0xb   : > { %p554_p4 = por %p46_p2, %p45_p1  ;;  %s33_s17 = ssub.s32 %s495_s10, %s670_s14 }
   0xc   : > { %p77_p6 = scmp.eq.s32.totalorder %s305_s12, 1  ;;  %p36_p7 = scmp.eq.s32.totalorder %s33_s17, 0 }
   0xd   : > { %p560_p8 = por %p52_p5, %p51_p3  ;;  %p83_p10 = scmp.eq.s32.totalorder %s306_s13, 1 }
   0xe   : > { %p564_p9 = por %p77_p6, %p45_p1  ;;  %p334_p13 = scmp.lt.s32.totalorder %s499_s11, 2 }
   0xf   : > { %s569_s20 = scalar_select %p36_p7, %s487_s8, %s38_s15  }
  0x10   : > { %p571_p11 = por %p83_p10, %p51_p3  ;;  %s103_s22 = sand.u32 1, %s487_s8  }
  0x11   : > { %s309_s23 = sshll.u32 %s103_s22, 3  ;;  %s320_s24 = sshll.u32 %s495_s10, 7 }
  0x12   : > { %s660_s21 = scalar_select %p571_p11, 1, 0 }
  0x13   : > { %s115_s27 = scalar_lea.hbm %s655_s0, %s320_s24  ;;  %s107_s28 = scalar_lea.vmem [#allocation2], %s309_s23 }
  0x14   : > { %s117_s29 = sshll.u32 %s107_s28, 4  ;;  %p584_p0 = pnand %p334_p13, %p554_p4  ;;  %s118_s29 = int_to_ptr.vmem [resolvable:$true] %s117_s29 }
  0x15   : > { %p312_p1 = scmp.ge.s32.totalorder %s499_s11, 1  ;;  %p122_p2 = scmp.lt.s32.totalorder %s499_s11, 3 }
  0x16   : > { %s104_s2 = scalar_lea.sflag [#allocation3], %s103_s22  ;;  %p393_p3 = pneg %p584_p0 }
  0x17   : > { %s404_s3 = scalar_lea.vmem %s118_s29, 128  ;;  %s501_s4 = smov [#allocation2]  }
  0x18   : > { %p405_p5 = scmp.ne.s32.totalorder %s118_s29, %s404_s3  ;;  %s409_s5 = sshll.u32 %s501_s4, 4  ;;  %s410_s5 = int_to_ptr.vmem [resolvable:$false] %s409_s5 }
  0x19   : > { %s411_s12 = scalar_lea.vmem %s410_s5, 256  ;;  %p412_p10 = scmp.lt.s32.totalorder %s118_s29, %s410_s5 }
  0x1a   : > { %p407_p6 = pnand %p405_p5, %p393_p3  ;;  %p413_p12 = scmp.lt.s32.totalorder %s411_s12, %s404_s3 }
  0x1c   : > { %p408_p7 = pneg %p407_p6  ;;  %p414_p4 = por %p413_p12, %p412_p10 }
  0x1e   : > { %p415_p13 = pnand %p414_p4, %p408_p7 }
  0x20   : > { %418 = shalt.err (!%p415_p13)
}
  0x21   : > { %329 = dma.hbm_to_vmem [thread:$0]  (!%p584_p0), %s115_s27, 128, %s118_s29, %s104_s2  }
  0x22   : > { %p123_p11 = pnand %p312_p1, %p122_p2 }
  0x23   : > { %s599_s13 = sand.u32 (!%p123_p11), 1, %s483_s7  }
  0x24   : > { %126 = sbr.rel (%p123_p11) target bundleno = 124 (0x7c), region = 24  ;;  %s313_s15 = sshll.u32 (!%p123_p11), %s599_s13, 3 }
  0x25   : > { %s129_s16 = scalar_lea.sflag (!%p123_p11), [#allocation3], %s599_s13  ;;  %s132_s17 = scalar_lea.vmem (!%p123_p11), [#allocation2], %s313_s15 }
  0x29   : > { %470 = dma.done.wait (%p560_p8), %s129_s16, 128  }
  0x2a   : > { %472 = vsyncadd (%p560_p8), %s129_s16, 4294967168  ;;  %vm157_vm0 = vcmask 1043456   ;;  %v153_v0 = vld [vmem:[%s132_s17] sm:$0xff]  ;;  %s150_s18 = scalar_lea.vmem [#allocation5], %s313_s15  ;;  %s321_s23 = sshll.u32 %s491_s9, 7 }
  0x2b   : > { %v155_v1 = vcombine.high %v153_v0, %v153_v0  ;;  %v158_v2 = vsel %vm157_vm0, %v153_v0, -inf  ;;  %s221_s22 = sshll.u32 %s150_s18, 4  ;;  %s219_s26 = scalar_lea.hbm %s656_s1, %s321_s23  ;;  %s222_s22 = int_to_ptr.vmem [resolvable:$true] %s221_s22 }
  0x2c   : > { %v159_v3 = vrot.slane %v158_v2, 4  ;;  %s205_s27 = scalar_lea.sflag [#allocation4], %s599_s13  ;;  %s419_s28 = scalar_lea.vmem %s222_s22, 128 }
  0x2d   : > { %v165_v4 = vsel %vm157_vm0, %v155_v1, -inf  ;;  %p420_p8 = scmp.ne.s32.totalorder %s222_s22, %s419_s28  ;;  %s502_s29 = smov [#allocation5]  }
  0x2e   : > { %v160_v5 = vmax.f32 %v158_v2, %v159_v3  ;;  %v166_v6 = vrot.slane %v165_v4, 4  ;;  %s423_s30 = sshll.u32 %s502_s29, 4  ;;  %s424_s30 = int_to_ptr.vmem [resolvable:$false] %s423_s30 }
  0x2f   : > { %p421_p11 = pnand %p420_p8, %p564_p9  ;;  %s425_s2 = scalar_lea.vmem %s424_s30, 256 }
  0x30   : > { %v161_v7 = vrot.slane %v160_v5, 2  ;;  %v167_v8 = vmax.f32 %v165_v4, %v166_v6  ;;  %p426_p0 = scmp.lt.s32.totalorder %s222_s22, %s424_s30  ;;  %p427_p1 = scmp.lt.s32.totalorder %s425_s2, %s419_s28 }
  0x31   : > { %p422_p12 = pneg %p421_p11 }
  0x32   : > { %v162_v9 = vmax.f32 %v160_v5, %v161_v7  ;;  %v168_v10 = vrot.slane %v167_v8, 2  ;;  %p428_p2 = por %p427_p1, %p426_p0 }
  0x34   : > { %v163_v11 = vrot.slane %v162_v9, 1  ;;  %v169_v12 = vmax.f32 %v167_v8, %v168_v10  ;;  %p429_p3 = pnand %p428_p2, %p422_p12 }
  0x36   : > { %v164_v13 = vmax.f32 %v162_v9, %v163_v11  ;;  %v170_v14 = vrot.slane %v169_v12, 1 }
  0x38   : > { %v171_v15 = vmax.f32 %v169_v12, %v170_v14 }
  0x3a   : > { %v174_v16 = vcombine.low %v164_v13, %v171_v15 }
  0x3c   : > { %v176_v17 = vsub.f32 %v153_v0, %v174_v16 }
  0x3e   : > { %v177_v18 = vmul.f32 1.442695, %v176_v17 }
  0x40   : > { %385 = vpow2.f32 %v177_v18 }
  0x4d   : > { %v386_v19 = vpop.eup %385 }
  0x4e   : > { %v180_v20 = vcombine.high %v386_v19, %v386_v19  ;;  %v182_v21 = vsel %vm157_vm0, %v386_v19, 0.0 }
  0x4f   : > { %v183_v22 = vrot.slane %v182_v21, 4 }
  0x50   : > { %v189_v23 = vsel %vm157_vm0, %v180_v20, 0.0 }
  0x51   : > { %v184_v24 = vadd.f32 %v183_v22, %v182_v21  ;;  %v190_v25 = vrot.slane %v189_v23, 4 }
  0x53   : > { %v185_v26 = vrot.slane %v184_v24, 2  ;;  %v191_v27 = vadd.f32 %v190_v25, %v189_v23 }
  0x55   : > { %v186_v28 = vadd.f32 %v185_v26, %v184_v24  ;;  %v192_v29 = vrot.slane %v191_v27, 2 }
  0x57   : > { %v187_v30 = vrot.slane %v186_v28, 1  ;;  %v193_v31 = vadd.f32 %v192_v29, %v191_v27 }
  0x59   : > { %v188_v32 = vadd.f32 %v187_v30, %v186_v28  ;;  %v194_v33 = vrot.slane %v193_v31, 1 }
  0x5b   : > { %v195_v34 = vadd.f32 %v194_v33, %v193_v31  ;;  %387 = vrcp.f32 %v188_v32 }
  0x5d   : > { %389 = vrcp.f32 %v195_v34 }
  0x68   : > { %v388_v35 = vpop.eup %387 }
  0x6a   : > { %v390_v36 = vpop.eup %389 }
  0x6b   : > { %v200_v37 = vcombine.low %v388_v35, %v390_v36 }
  0x6d   : > { %v202_v38 = vmul.f32 %v386_v19, %v200_v37 }
  0x6f   : > { %203 = vst [vmem:[%s150_s18] sm:$0xff] %v202_v38 }
  0x70   : > { %432 = shalt.err (!%p429_p3)
}
  0x71   : > { %s433_s9 = scalar_lea.hbm %s219_s26, 128  ;;  %s437_s5 = scalar_lea.hbm %s656_s1, 256 }
  0x72   : > { %p434_p5 = scmp.ne.s32.totalorder %s219_s26, %s433_s9  ;;  %p438_p10 = scmp.lt.s32.totalorder %s219_s26, %s656_s1 }
  0x73   : > { %p439_p4 = scmp.lt.s32.totalorder %s437_s5, %s433_s9 }
  0x74   : > { %p435_p6 = pnand %p434_p5, %p564_p9 }
  0x75   : > { %p440_p13 = por %p439_p4, %p438_p10 }
  0x76   : > { %p436_p7 = pneg %p435_p6 }
  0x78   : > { %p441_p8 = pnand %p440_p13, %p436_p7 }
  0x7a   : > { %444 = shalt.err (!%p441_p8)
}
  0x7b   : > { %324 = dma.vmem_to_hbm [thread:$0]  (%p564_p9), %s222_s22, 128, %s219_s26, %s205_s27  }
  0x7c PF: > { %s233_s15 = sand.u32 1, %s479_s6   ;;  %p662_p11 = scmp.ne.s32.totalorder %s660_s21, 0 }
  0x7d   : > { %p663_p12 = scmp.ge.s32.totalorder %s499_s11, 2  ;;  %s234_s16 = scalar_lea.sflag [#allocation4], %s233_s15 }
  0x7f   : > { %p331_p0 = pnand %p663_p12, %p662_p11 }
  0x81   : > { %p332_p1 = pneg %p331_p0 }
  0x83   : > { %474 = dma.done.wait (%p332_p1), %s234_s16, 128  }
  0x84   : > { %476 = vsyncadd (%p332_p1), %s234_s16, 4294967168  ;;  %s17_s11 = sadd.s32 1, %s499_s11   ;;  %s664_s6 = smov %s483_s7 }
  0x85   : > { %p14_p2 = scmp.ge.s32.totalorder %s17_s11, 4   ;;  %s665_s7 = smov %s487_s8 }
  0x86   : > { %s666_s8 = smov %s569_s20  ;;  %s667_s9 = smov %s495_s10 }
  0x87   : > { %s668_s10 = smov %s670_s14  ;;  %16 = sbr.rel (!%p14_p2) target bundleno = 6 (0x6), region = 69 }
  0x8c   :  { %239 = vsyncpa [#allocation3], 1 }
  0x8d   :  { %241 = vsyncpa [#allocation3 + $0x1], 1 }
  0x8e   :  { %242 = vsyncpa [#allocation4], 1 }
  0x8f   :  { %244 = vsyncpa [#allocation4 + $0x1], 1 }

</bundles_post_ra>
